<compile_context>
chip_gen: v6e
topology: v6e:2x2x1
jax: 0.10.0
libtpu: 0.0.40
codegen_flags: <defaults>
</compile_context>

<pallas_src>
import functools

import jax
import jax.numpy as jnp
from jax.experimental import pallas as pl
from jax.experimental.pallas import tpu as pltpu


_BLOCK_BUDGET_BYTES = 4 * 1024 * 1024     # per-grid-step tile budget, in x.dtype bytes
_VMEM_LIMIT_BYTES = 48 * 1024 * 1024      # <= ~48 MiB: safe on v7x (64 MiB) and v5e/v6e
_PALLAS_MIN_BYTES = 1 * 1024 * 1024       # below this, use the fused jnp fallback


def _layernorm_kernel(x_ref, gamma_ref, beta_ref, o_ref, *, eps):
    # x_ref: (Bt, C, tT) block; normalize over C (the sublane axis).
    x = x_ref[...].astype(jnp.float32)
    mean = jnp.mean(x, axis=1, keepdims=True)             # (Bt, 1, tT)
    mean_sq = jnp.mean(x * x, axis=1, keepdims=True)      # one-pass E[x^2]
    var = mean_sq - mean * mean                           # no block-sized xc scratch
    inv = jax.lax.rsqrt(var + eps)                        # EUP slot (free-ish)
    g = gamma_ref[...]                                    # (C, 1) f32, resident in VMEM
    b = beta_ref[...]                                     # (C, 1) f32, resident in VMEM
    y = (x - mean) * inv * g[None, :, :] + b[None, :, :]
    o_ref[...] = y.astype(o_ref.dtype)


def _choose_blocks(B, C, T, itemsize):
    """Pick (block_b, block_t): lane tile (multiple of 128 or full T) + batch packing."""
    budget = _BLOCK_BUDGET_BYTES
    row_bytes = C * itemsize
    if C * T * itemsize <= budget:
        block_t = T                                       # full T: always layout-legal
    else:
        bt = (budget // max(row_bytes, 1)) // 128 * 128
        block_t = int(max(128, min(bt, T)))
    per_batch = C * block_t * itemsize
    block_b = int(max(1, min(B, budget // max(per_batch, 1))))

    # Keep >= 2 grid steps so both v7x TensorCores get work (parallel axes).
    grid_steps = (-(-B // block_b)) * (-(-T // block_t))
    if grid_steps < 2:
        if B >= 2:
            block_b = -(-B // 2)                          # ceil(B/2) -> 2 batch tiles
        elif T >= 256:
            block_t = max(128, ((T // 2) // 128) * 128)   # >= 2 lane-dense T tiles
    return block_b, block_t


def _layer_norm_jnp(x, gamma, beta, eps):
    """Fused XLA path for tiny tensors (f32 accumulation, same semantics)."""
    xf = x.astype(jnp.float32)
    mean = jnp.mean(xf, axis=1, keepdims=True)
    var = jnp.mean((xf - mean) ** 2, axis=1, keepdims=True)
    y = (xf - mean) * jax.lax.rsqrt(var + eps)
    y = (y * gamma.astype(jnp.float32).reshape(1, -1, 1)
         + beta.astype(jnp.float32).reshape(1, -1, 1))
    return y.astype(x.dtype)


def layer_norm(x, gamma, beta, eps=1e-4, *, block_b=None, block_t=None,
               force_pallas=False):
    """x: [B, C, T]; gamma, beta: [C].  Returns [B, C, T] (same dtype as x)."""
    B, C, T = x.shape
    itemsize = jnp.dtype(x.dtype).itemsize

    # Small-tensor fallback: Pallas launch overhead + (8,128) padding dominate.
    if (not force_pallas and block_b is None and block_t is None
            and B * C * T * itemsize < _PALLAS_MIN_BYTES):
        return _layer_norm_jnp(x, gamma, beta, eps)

    auto_b, auto_t = _choose_blocks(B, C, T, itemsize)
    if block_b is None:
        block_b = auto_b
    if block_t is None:
        block_t = auto_t

    gamma2d = gamma.reshape(C, 1).astype(jnp.float32)
    beta2d = beta.reshape(C, 1).astype(jnp.float32)

    grid = (pl.cdiv(B, block_b), pl.cdiv(T, block_t))
    kernel = functools.partial(_layernorm_kernel, eps=eps)
    return pl.pallas_call(
        kernel,
        out_shape=jax.ShapeDtypeStruct((B, C, T), x.dtype),
        grid_spec=pltpu.PrefetchScalarGridSpec(
            num_scalar_prefetch=0,
            grid=grid,
            in_specs=[
                pl.BlockSpec((block_b, C, block_t), lambda b, t: (b, 0, t)),
                pl.BlockSpec((C, 1), lambda b, t: (0, 0)),   # resident in VMEM
                pl.BlockSpec((C, 1), lambda b, t: (0, 0)),   # resident in VMEM
            ],
            out_specs=pl.BlockSpec((block_b, C, block_t), lambda b, t: (b, 0, t)),
        ),
        compiler_params=pltpu.CompilerParams(
            dimension_semantics=("parallel", "parallel"),
            vmem_limit_bytes=_VMEM_LIMIT_BYTES,
        ),
    )(x, gamma2d, beta2d)


def layer_norm_ref(x, gamma, beta, eps=1e-4):
    mean = jnp.mean(x, axis=1, keepdims=True)
    var = jnp.mean((x - mean) ** 2, axis=1, keepdims=True)
    xn = (x - mean) * jax.lax.rsqrt(var + eps)
    return xn * gamma.reshape(1, -1, 1) + beta.reshape(1, -1, 1)


if __name__ == "__main__":
    key = jax.random.PRNGKey(0)
    k0, k1, k2, k3 = jax.random.split(key, 4)

    # 1) Small shape matching the DurationPredictor usage (x is [B, C, T]).
    #    This size goes through the jnp fallback; also force the Pallas path
    #    once to verify kernel correctness on tiny, fully in-block tiles.
    B, C, T = 2, 4, 16
    x = jax.random.normal(k0, (B, C, T), dtype=jnp.float32)
    gamma = jnp.ones((C,), dtype=jnp.float32)       # nn.Parameter(torch.ones)
    beta = jnp.zeros((C,), dtype=jnp.float32)       # nn.Parameter(torch.zeros)
    ref = layer_norm_ref(x, gamma, beta, eps=1e-4)

    out_fb = jax.block_until_ready(layer_norm(x, gamma, beta, eps=1e-4))
    assert out_fb.shape == (B, C, T)
    assert jnp.allclose(out_fb, ref, atol=2e-5, rtol=1e-5)

    out_pl = jax.block_until_ready(
        layer_norm(x, gamma, beta, eps=1e-4, force_pallas=True))
    assert out_pl.shape == (B, C, T)
    assert jnp.allclose(out_pl, ref, atol=2e-5, rtol=1e-5)

    # 2) Exercise the 2-D tiled path (T tiled in 128-lane blocks, including a
    #    ragged edge block) with non-trivial gamma/beta.
    B2, C2, T2 = 2, 8, 320
    x2 = jax.random.normal(k1, (B2, C2, T2), dtype=jnp.float32)
    gamma2 = 1.0 + 0.1 * jax.random.normal(k2, (C2,), dtype=jnp.float32)
    beta2 = 0.1 * jnp.arange(C2, dtype=jnp.float32)
    out2 = jax.block_until_ready(
        layer_norm(x2, gamma2, beta2, eps=1e-4, block_b=1, block_t=128))
    ref2 = layer_norm_ref(x2, gamma2, beta2, eps=1e-4)
    assert out2.shape == (B2, C2, T2)
    assert jnp.allclose(out2, ref2, atol=2e-5, rtol=1e-5)

    # 3) Auto block choice on a larger tensor (goes through the Pallas path,
    #    batch packing + >= 2 grid steps for dual-TC chips).
    B3, C3, T3 = 4, 192, 1536
    x3 = jax.random.normal(k3, (B3, C3, T3), dtype=jnp.float32)
    gamma3 = 1.0 + 0.05 * jnp.arange(C3, dtype=jnp.float32) / C3
    beta3 = 0.01 * jnp.arange(C3, dtype=jnp.float32)
    out3 = jax.block_until_ready(layer_norm(x3, gamma3, beta3, eps=1e-4))
    ref3 = layer_norm_ref(x3, gamma3, beta3, eps=1e-4)
    assert out3.shape == (B3, C3, T3)
    assert jnp.allclose(out3, ref3, atol=2e-5, rtol=1e-5)

    print("KERNEL_OK")
</pallas_src>

<mosaic_0001>
module attributes {stable_mosaic.version = 11 : i64} {
  func.func @_layernorm_kernel(%arg0: i32, %arg1: i32, %arg2: memref<1x4x16xf32, #tpu.memory_space<vmem>>, %arg3: memref<4x1xf32, #tpu.memory_space<vmem>>, %arg4: memref<4x1xf32, #tpu.memory_space<vmem>>, %arg5: memref<1x4x16xf32, #tpu.memory_space<vmem>>) attributes {dimension_semantics = [#tpu.dimension_semantics<parallel>, #tpu.dimension_semantics<parallel>], iteration_bounds = array<i64: 2, 1>, scalar_prefetch = 0 : i64, scratch_operands = 0 : i64, tpu.core_type = #tpu.core_type<tc>, window_params = [{transform_indices = @transform_0, window_bounds = array<i64: 1, 4, 16>}, {pipeline_mode = #tpu.pipeline_mode<synchronous>, transform_indices = @transform_1, window_bounds = array<i64: 4, 1>}, {pipeline_mode = #tpu.pipeline_mode<synchronous>, transform_indices = @transform_2, window_bounds = array<i64: 4, 1>}, {transform_indices = @transform_3, window_bounds = array<i64: 1, 4, 16>}]} {
    %c0 = arith.constant 0 : index
    %c0_0 = arith.constant 0 : index
    %c0_1 = arith.constant 0 : index
    %0 = vector.load %arg2[%c0, %c0_0, %c0_1] : memref<1x4x16xf32, #tpu.memory_space<vmem>>, vector<1x4x16xf32>
    %cst = arith.constant dense<0.000000e+00> : vector<1x16xf32>
    %1 = vector.multi_reduction <add>, %0, %cst [1] : vector<1x4x16xf32> to vector<1x16xf32>
    %2 = vector.shape_cast %1 : vector<1x16xf32> to vector<1x1x16xf32>
    %cst_2 = arith.constant 4.000000e+00 : f32
    %3 = vector.broadcast %cst_2 : f32 to vector<1x1x16xf32>
    %4 = arith.divf %2, %3 : vector<1x1x16xf32>
    %5 = arith.mulf %0, %0 : vector<1x4x16xf32>
    %cst_3 = arith.constant dense<0.000000e+00> : vector<1x16xf32>
    %6 = vector.multi_reduction <add>, %5, %cst_3 [1] : vector<1x4x16xf32> to vector<1x16xf32>
    %7 = vector.shape_cast %6 : vector<1x16xf32> to vector<1x1x16xf32>
    %cst_4 = arith.constant 4.000000e+00 : f32
    %8 = vector.broadcast %cst_4 : f32 to vector<1x1x16xf32>
    %9 = arith.divf %7, %8 : vector<1x1x16xf32>
    %10 = arith.mulf %4, %4 : vector<1x1x16xf32>
    %11 = arith.subf %9, %10 : vector<1x1x16xf32>
    %cst_5 = arith.constant 9.99999974E-5 : f32
    %12 = vector.broadcast %cst_5 : f32 to vector<1x1x16xf32>
    %13 = arith.addf %11, %12 : vector<1x1x16xf32>
    %14 = math.rsqrt %13 : vector<1x1x16xf32>
    %c0_6 = arith.constant 0 : index
    %c0_7 = arith.constant 0 : index
    %15 = vector.load %arg3[%c0_6, %c0_7] : memref<4x1xf32, #tpu.memory_space<vmem>>, vector<4x1xf32>
    %c0_8 = arith.constant 0 : index
    %c0_9 = arith.constant 0 : index
    %16 = vector.load %arg4[%c0_8, %c0_9] : memref<4x1xf32, #tpu.memory_space<vmem>>, vector<4x1xf32>
    %17 = vector.broadcast %4 : vector<1x1x16xf32> to vector<1x4x16xf32>
    %18 = arith.subf %0, %17 : vector<1x4x16xf32>
    %19 = vector.broadcast %14 : vector<1x1x16xf32> to vector<1x4x16xf32>
    %20 = arith.mulf %18, %19 : vector<1x4x16xf32>
    %21 = vector.shape_cast %15 : vector<4x1xf32> to vector<1x4x1xf32>
    %22 = vector.broadcast %21 : vector<1x4x1xf32> to vector<1x4x16xf32>
    %23 = arith.mulf %20, %22 : vector<1x4x16xf32>
    %24 = vector.shape_cast %16 : vector<4x1xf32> to vector<1x4x1xf32>
    %25 = vector.broadcast %24 : vector<1x4x1xf32> to vector<1x4x16xf32>
    %26 = arith.addf %23, %25 : vector<1x4x16xf32>
    %c0_10 = arith.constant 0 : index
    %c0_11 = arith.constant 0 : index
    %c0_12 = arith.constant 0 : index
    %27 = vector.load %arg5[%c0_10, %c0_11, %c0_12] : memref<1x4x16xf32, #tpu.memory_space<vmem>>, vector<1x4x16xf32>
    tpu.vector_store %arg5[%c0_10, %c0_11, %c0_12], %26 {strides = array<i32>} : memref<1x4x16xf32, #tpu.memory_space<vmem>>, vector<1x4x16xf32>,
    return
  }
  func.func @transform_0(%arg0: i32, %arg1: i32) -> (i32, i32, i32) {
    %c0_i32 = arith.constant 0 : i32
    %c0_i32_0 = arith.constant 0 : i32
    return %arg0, %c0_i32, %arg1 : i32, i32, i32
  }
  func.func @transform_1(%arg0: i32, %arg1: i32) -> (i32, i32) {
    %c0_i32 = arith.constant 0 : i32
    %c0_i32_0 = arith.constant 0 : i32
    %c0_i32_1 = arith.constant 0 : i32
    return %c0_i32, %c0_i32_0 : i32, i32
  }
  func.func @transform_2(%arg0: i32, %arg1: i32) -> (i32, i32) {
    %c0_i32 = arith.constant 0 : i32
    %c0_i32_0 = arith.constant 0 : i32
    %c0_i32_1 = arith.constant 0 : i32
    return %c0_i32, %c0_i32_0 : i32, i32
  }
  func.func @transform_3(%arg0: i32, %arg1: i32) -> (i32, i32, i32) {
    %c0_i32 = arith.constant 0 : i32
    %c0_i32_0 = arith.constant 0 : i32
    return %arg0, %c0_i32, %arg1 : i32, i32, i32
  }
}

</mosaic_0001>

<bundles_post_ra>
// kernel: tpu_custom_call.1
= control target key start
LH: loop header
LB: loop body
LE: loop exit
PB: predicated region body
PF: predicated region fallthrough
CT: control target
= control target key end

     0   :  { %8 = vsyncpa [#allocation3], 0  ;;  %s596_s0 = inlined_call_operand.vmem [shape: f32[2,4,16], index: 0, kind: input, shape index: {}]   ;;  %s597_s1 = inlined_call_operand.vmem [shape: f32[4,1], index: 1, kind: input, shape index: {}]   ;;  %s598_s2 = inlined_call_operand.vmem [shape: f32[4,1], index: 2, kind: input, shape index: {}]   ;;  %s599_s3 = inlined_call_operand.hbm [shape: f32[2,4,16], index: 3, kind: output, shape index: {}]  }
   0x1   :  { %10 = vsyncpa [#allocation3 + $0x1], 0  ;;  %s488_s12 = smov 0   ;;  %s490_s13 = smov 0  }
   0x2   :  { %s492_s14 = smov 0   ;;  %s494_s15 = smov 0  }
   0x3   :  { %s496_s16 = smov 0   ;;  %s498_s17 = smov 0  }
   0x4 LB: > { %s318_s18 = sadd.s32 4294967295, %s464_s17   ;;  %s319_s19 = sadd.s32 4294967294, %s464_s17   ;;  %s464_s17 = sphi %s498_s17, %s16_s17   ;;  %s460_s16 = sphi %s496_s16, %s606_s16   ;;  %s456_s15 = sphi %s494_s15, %s605_s15   ;;  %s452_s14 = sphi %s492_s14, %s604_s14   ;;  %s448_s13 = sphi %s490_s13, %s603_s13   ;;  %s444_s12 = sphi %s488_s12, %s602_s12  }
   0x5   : > { %s28_s20 = sadd.s32 1, %s460_s16  ;;  %s107_s21 = sadd.s32 1, %s452_s14 }
   0x6   : > { %p30_p0 = scmp.ge.s32.totalorder %s28_s20, 2  ;;  %p117_p1 = scmp.ne.s32.totalorder %s452_s14, %s448_s13 }
   0x7   : > { %p118_p2 = scmp.eq.s32.totalorder %s318_s18, 1  ;;  %p123_p3 = scmp.ne.s32.totalorder %s448_s13, %s444_s12 }
   0x8   : > { %s608_s20 = smov (%p30_p0, %s28_s20), 0  ;;  %p124_p5 = scmp.eq.s32.totalorder %s319_s19, 1 }
   0x9   : > { %p528_p4 = por %p118_p2, %p117_p1  ;;  %s102_s23 = ssub.s32 %s460_s16, %s608_s20 }
   0xa   : > { %p322_p6 = scmp.ge.s32.totalorder %s464_s17, 1  ;;  %p105_p7 = scmp.eq.s32.totalorder %s102_s23, 0 }
   0xb   : > { %p535_p8 = por %p124_p5, %p123_p3  ;;  %p158_p9 = scmp.lt.s32.totalorder %s464_s17, 3 }
   0xc   : > { %s541_s25 = scalar_select %p105_p7, %s452_s14, %s107_s21  }
   0xd   : > { %p159_p10 = pnand %p322_p6, %p158_p9 }
   0xe   : > { %p184_p11 = scmp.lt.s32.totalorder (!%p159_p10), %s456_s15, 1  ;;  %s181_s8 = sand.u32 (!%p159_p10), 1, %s448_s13  }
   0xf   : > { %162 = sbr.rel (%p159_p10) target bundleno = 165 (0xa5), region = 32  ;;  %s323_s9 = sshll.u32 (!%p159_p10), %s181_s8, 2 }
  0x10   : > { %s326_s10 = sshll.u32 (!%p159_p10), %s456_s15, 6  ;;  %s183_s11 = scalar_lea.vmem (!%p159_p10), [#allocation2], %s323_s9 }
  0x11   : > { %s247_s18 = sshll.u32 (!%p159_p10), %s183_s11, 4  ;;  %s245_s23 = scalar_lea.hbm (!%p159_p10), %s599_s3, %s326_s10  ;;  %s248_s18 = int_to_ptr.vmem [resolvable:$true] %s247_s18 }
  0x12   : > { %s233_s26 = scalar_lea.sflag (!%p159_p10), [#allocation3], %s181_s8  ;;  %s388_s27 = scalar_lea.vmem (!%p159_p10), %s248_s18, 64 }
  0x13   : > { %p389_p12 = scmp.ne.s32.totalorder (!%p159_p10), %s248_s18, %s388_s27  ;;  %s467_s28 = smov (!%p159_p10), [#allocation2]  }
  0x14   : > { %v215_v0 = vld [vmem:[%s597_s1] sm:$0xf]  ;;  %v466_v1 = vmov 0   ;;  %s185_s30 = scalar_select %p184_p11, %s456_s15, 1  ;;  %vm192_vm0 = vcmask 125952  }
  0x15   : > { %385 = vset.pattern.permute.xlu0 %v466_v1  ;;  %v216_v2 = vld [vmem:[%s598_s2] sm:$0xf]  ;;  %p390_p13 = pnand %p389_p12, %p528_p4  ;;  %s392_s15 = sshll.u32 %s467_s28, 4  ;;  %s393_s15 = int_to_ptr.vmem [resolvable:$false] %s392_s15 }
  0x16   : > { %221 = vperm.xlu0 %385, %v215_v0   ;;  %s324_s4 = sshll.u32 %s185_s30, 2  ;;  %s394_s29 = scalar_lea.vmem %s393_s15, 128 }
  0x17   : > { %s190_s7 = scalar_lea.vmem %s596_s0, %s324_s4  ;;  %p391_p0 = pneg %p390_p13 }
  0x18   : > { %v191_v3 = vld [vmem:[%s190_s7] sm:$0xf]  ;;  %p395_p1 = scmp.lt.s32.totalorder %s248_s18, %s393_s15  ;;  %p396_p2 = scmp.lt.s32.totalorder %s394_s29, %s388_s27 }
  0x19   : > { %v193_v4 = vsel %vm192_vm0, %v191_v3, 0.0  ;;  %v202_v5 = vmul.f32 %v191_v3, %v191_v3 }
  0x1a   : > { %227 = vperm.xlu0 %385, %v216_v2   ;;  %v194_v6 = vrot.slane %v193_v4, 4  ;;  %p397_p3 = por %p396_p2, %p395_p1 }
  0x1b   : > { %v203_v7 = vsel %vm192_vm0, %v202_v5, 0.0 }
  0x1c   : > { %v195_v8 = vadd.f32 %v194_v6, %v193_v4  ;;  %v204_v9 = vrot.slane %v203_v7, 4  ;;  %p398_p5 = pnand %p397_p3, %p391_p0 }
  0x1e   : > { %v196_v10 = vrot.slane %v195_v8, 2  ;;  %v205_v11 = vadd.f32 %v204_v9, %v203_v7 }
  0x20   : > { %v197_v12 = vadd.f32 %v196_v10, %v195_v8  ;;  %v206_v13 = vrot.slane %v205_v11, 2 }
  0x22   : > { %v198_v14 = vrot.slane %v197_v12, 1  ;;  %v207_v15 = vadd.f32 %v206_v13, %v205_v11 }
  0x24   : > { %v199_v16 = vadd.f32 %v198_v14, %v197_v12  ;;  %v208_v17 = vrot.slane %v207_v15, 1 }
  0x26   : > { %v201_v18 = vmul.f32 0.25, %v199_v16  ;;  %v209_v19 = vadd.f32 %v208_v17, %v207_v15 }
  0x28   : > { %v210_v20 = vmul.f32 0.25, %v209_v19  ;;  %v211_v21 = vmul.f32 %v201_v18, %v201_v18  ;;  %v217_v24 = vsub.f32 %v191_v3, %v201_v18 }
  0x2a   : > { %v212_v22 = vsub.f32 %v210_v20, %v211_v21 }
  0x2c   : > { %v213_v23 = vadd.f32 0.0001, %v212_v22 }
  0x2e   : > { %386 = vrsqrt.f32 %v213_v23 }
  0x3b   : > { %v387_v25 = vpop.eup %386 }
  0x3c   : > { %v218_v26 = vmul.f32 %v387_v25, %v217_v24 }
  0x91   : > { %v222_v27 = vpop.permute.xlu0 %221 }
  0x92   : > { %v224_v28 = vmul.f32 %v222_v27, %v218_v26 }
  0x95   : > { %v228_v29 = vpop.permute.xlu0 %227 }
  0x96   : > { %v230_v30 = vadd.f32 %v228_v29, %v224_v28 }
  0x98   : > { %231 = vst.msk [vmem:[%s183_s11] sm:$0xf] %vm192_vm0, %v230_v30 }
  0x99   : > { %401 = shalt.err (!%p398_p5)
}
  0x9a   : > { %s402_s30 = scalar_lea.hbm %s245_s23, 64  ;;  %s406_s6 = scalar_lea.hbm %s599_s3, 128 }
  0x9b   : > { %p403_p6 = scmp.ne.s32.totalorder %s245_s23, %s402_s30  ;;  %p407_p10 = scmp.lt.s32.totalorder %s245_s23, %s599_s3 }
  0x9c   : > { %p408_p11 = scmp.lt.s32.totalorder %s406_s6, %s402_s30 }
  0x9d   : > { %p404_p7 = pnand %p403_p6, %p528_p4 }
  0x9e   : > { %p409_p12 = por %p408_p11, %p407_p10 }
  0x9f   : > { %p405_p9 = pneg %p404_p7 }
  0xa1   : > { %p410_p13 = pnand %p409_p12, %p405_p9 }
  0xa3   : > { %413 = shalt.err (!%p410_p13)
}
  0xa4   : > { %329 = dma.vmem_to_hbm [thread:$0]  (%p528_p4), %s248_s18, 64, %s245_s23, %s233_s26  }
  0xa5 PF: > { %p335_p0 = scmp.ge.s32.totalorder %s464_s17, 2  ;;  %s259_s9 = sand.u32 1, %s444_s12  }
  0xa6   : > { %s260_s10 = scalar_lea.sflag [#allocation3], %s259_s9 }
  0xa7   : > { %p332_p1 = pnand %p335_p0, %p535_p8 }
  0xa9   : > { %p333_p2 = pneg %p332_p1 }
  0xab   : > { %439 = dma.done.wait (%p333_p2), %s260_s10, 64  }
  0xac   : > { %441 = vsyncadd (%p333_p2), %s260_s10, 4294967232  ;;  %s16_s17 = sadd.s32 1, %s464_s17   ;;  %s602_s12 = smov %s448_s13 }
  0xad   : > { %p13_p3 = scmp.ge.s32.totalorder %s16_s17, 4   ;;  %s603_s13 = smov %s452_s14 }
  0xae   : > { %s604_s14 = smov %s541_s25  ;;  %s605_s15 = smov %s460_s16 }
  0xaf   : > { %s606_s16 = smov %s608_s20  ;;  %15 = sbr.rel (!%p13_p3) target bundleno = 4 (0x4), region = 67 }
  0xb4   :  { %265 = vsyncpa [#allocation3], 1 }
  0xb5   :  { %267 = vsyncpa [#allocation3 + $0x1], 1 }

</bundles_post_ra>
